<compile_context>
chip_gen: v7x
topology: tpu7x:2x2x1
jax: 0.10.0
libtpu: 0.0.40
codegen_flags: <defaults>
</compile_context>

<pallas_src>
import jax
import jax.numpy as jnp
from jax.experimental import pallas as pl
from jax.experimental.pallas import tpu as pltpu


def _pos_add_kernel(x_ref, pos_ref, o_ref):
    # x_ref: (Bt, L*D), pos_ref: (1, L*D) -> broadcast add, lane-dense store.
    o_ref[...] = x_ref[...] + pos_ref[...]


def _pos_add_dropout_kernel(x_ref, pos_ref, mask_ref, o_ref):
    # mask_ref already carries the inverted-dropout scale (0 or 1/(1-p)).
    o_ref[...] = (x_ref[...] + pos_ref[...]) * mask_ref[...]


def _pick_batch_tile(B, row_bytes, target_bytes=2 << 20):
    """Batch-tile size: whole batch if tiny, else a multiple of 8 sized so the
    block is ~2 MiB (comfortably inside v7x's 32 MiB scoped VMEM even with
    double-buffered x/mask/out blocks)."""
    if B <= 8:
        return B
    bt = (target_bytes // max(row_bytes, 1)) // 8 * 8
    bt = max(8, bt)
    return min(B, bt)


def positional_embedding(x, pos_weight, *, dropout_p=0.0, rng_key=None,
                         training=False):
    """x: (B, L, D); pos_weight: (max_len, D). Returns (B, L, D)."""
    B, L, D = x.shape
    assert pos_weight.shape[1] == D and pos_weight.shape[0] >= L
    LD = L * D

    # Lane-dense 2-D layout (full L*D on the last axis satisfies the (8,128)
    # rule via the "equals full array dim" exemption for any L, D).
    x2 = x.reshape(B, LD)
    pos2 = pos_weight[:L, :].reshape(1, LD)

    bt = _pick_batch_tile(B, LD * x.dtype.itemsize)
    grid = (pl.cdiv(B, bt),)

    x_spec = pl.BlockSpec((bt, LD), lambda b: (b, 0))
    pos_spec = pl.BlockSpec((1, LD), lambda b: (0, 0))   # resident in VMEM
    out_spec = pl.BlockSpec((bt, LD), lambda b: (b, 0))

    apply_dropout = bool(training) and float(dropout_p) > 0.0
    if apply_dropout:
        if rng_key is None:
            rng_key = jax.random.PRNGKey(0)
        keep = jax.random.bernoulli(rng_key, 1.0 - float(dropout_p), (B, LD))
        mask = keep.astype(x.dtype) * jnp.asarray(
            1.0 / (1.0 - float(dropout_p)), dtype=x.dtype)
        kernel = _pos_add_dropout_kernel
        in_specs = [x_spec, pos_spec, pl.BlockSpec((bt, LD), lambda b: (b, 0))]
        args = (x2, pos2, mask)
    else:
        kernel = _pos_add_kernel
        in_specs = [x_spec, pos_spec]
        args = (x2, pos2)

    out2 = pl.pallas_call(
        kernel,
        out_shape=jax.ShapeDtypeStruct((B, LD), x.dtype),
        grid_spec=pltpu.PrefetchScalarGridSpec(
            num_scalar_prefetch=0,
            grid=grid,
            in_specs=in_specs,
            out_specs=out_spec,
        ),
        compiler_params=pltpu.CompilerParams(
            dimension_semantics=("parallel",),
        ),
    )(*args)

    return out2.reshape(B, L, D)


if __name__ == "__main__":
    # Small shapes consistent with the module: batch=2, seq=8, d_model=32.
    B, L, D = 2, 8, 32
    max_len = 16
    dropout_ratio = 0.1

    key = jax.random.PRNGKey(0)
    kx, kw, kd = jax.random.split(key, 3)
    x = jax.random.normal(kx, (B, L, D), dtype=jnp.float32)
    # Deterministic parameter init (nn.Embedding weight ~ N(0, 1)).
    pos_weight = jax.random.normal(kw, (max_len, D), dtype=jnp.float32)

    # Eval-mode forward (dropout is identity), checked against a JAX reference.
    out = positional_embedding(x, pos_weight, dropout_p=dropout_ratio,
                               training=False)
    out = jax.block_until_ready(out)
    ref = x + pos_weight[:L, :][None, :, :]
    assert jnp.allclose(out, ref, atol=1e-6), "mismatch vs reference (eval)"

    # Training (dropout) path: every element must be either 0 or the
    # inverted-dropout-scaled (x + pos) value.
    out_train = positional_embedding(x, pos_weight, dropout_p=dropout_ratio,
                                     rng_key=kd, training=True)
    out_train = jax.block_until_ready(out_train)
    scaled = ref / (1.0 - dropout_ratio)
    ok = jnp.isclose(out_train, 0.0, atol=1e-6) | jnp.isclose(
        out_train, scaled, atol=1e-5)
    assert bool(jnp.all(ok)), "mismatch vs reference (train/dropout)"

    print("KERNEL_OK")
</pallas_src>

<mosaic_0001>
module attributes {stable_mosaic.version = 11 : i64} {
  func.func @_pos_add_kernel(%arg0: i32, %arg1: memref<2x256xf32, #tpu.memory_space<vmem>>, %arg2: memref<1x256xf32, #tpu.memory_space<vmem>>, %arg3: memref<2x256xf32, #tpu.memory_space<vmem>>) attributes {dimension_semantics = [#tpu.dimension_semantics<parallel>], iteration_bounds = array<i64: 1>, scalar_prefetch = 0 : i64, scratch_operands = 0 : i64, tpu.core_type = #tpu.core_type<tc>, window_params = [{transform_indices = @transform_0, window_bounds = array<i64: 2, 256>}, {pipeline_mode = #tpu.pipeline_mode<synchronous>, transform_indices = @transform_1, window_bounds = array<i64: 1, 256>}, {transform_indices = @transform_2, window_bounds = array<i64: 2, 256>}]} {
    %c0 = arith.constant 0 : index
    %c0_0 = arith.constant 0 : index
    %0 = vector.load %arg1[%c0, %c0_0] : memref<2x256xf32, #tpu.memory_space<vmem>>, vector<2x256xf32>
    %c0_1 = arith.constant 0 : index
    %c0_2 = arith.constant 0 : index
    %1 = vector.load %arg2[%c0_1, %c0_2] : memref<1x256xf32, #tpu.memory_space<vmem>>, vector<1x256xf32>
    %2 = vector.broadcast %1 : vector<1x256xf32> to vector<2x256xf32>
    %3 = arith.addf %0, %2 : vector<2x256xf32>
    %c0_3 = arith.constant 0 : index
    %c0_4 = arith.constant 0 : index
    %4 = vector.load %arg3[%c0_3, %c0_4] : memref<2x256xf32, #tpu.memory_space<vmem>>, vector<2x256xf32>
    tpu.vector_store %arg3[%c0_3, %c0_4], %3 {strides = array<i32>} : memref<2x256xf32, #tpu.memory_space<vmem>>, vector<2x256xf32>,
    return
  }
  func.func @transform_0(%arg0: i32) -> (i32, i32) {
    %c0_i32 = arith.constant 0 : i32
    %c0_i32_0 = arith.constant 0 : i32
    return %arg0, %c0_i32 : i32, i32
  }
  func.func @transform_1(%arg0: i32) -> (i32, i32) {
    %c0_i32 = arith.constant 0 : i32
    %c0_i32_0 = arith.constant 0 : i32
    %c0_i32_1 = arith.constant 0 : i32
    return %c0_i32, %c0_i32_0 : i32, i32
  }
  func.func @transform_2(%arg0: i32) -> (i32, i32) {
    %c0_i32 = arith.constant 0 : i32
    %c0_i32_0 = arith.constant 0 : i32
    return %arg0, %c0_i32 : i32, i32
  }
}

</mosaic_0001>

<bundles_post_ra>
// kernel: tpu_custom_call.1
= control target key start
LH: loop header
LB: loop body
LE: loop exit
PB: predicated region body
PF: predicated region fallthrough
CT: control target
= control target key end

     0   :  { %7 = vsyncpa [#allocation3], 0  ;;  %s157_s0 = inlined_call_operand.hbm [shape: f32[2,256], index: 0, kind: input, shape index: {}]   ;;  %s158_s1 = inlined_call_operand.vmem [shape: f32[1,256], index: 1, kind: input, shape index: {}]   ;;  %s159_s2 = inlined_call_operand.hbm [shape: f32[2,256], index: 2, kind: output, shape index: {}]  }
   0x1   :  { %8 = vsyncpa [#allocation4], 0  ;;  %s112_s9 = smov [#allocation2]   ;;  %s64_s13 = scalar_lea.hbm %s157_s0, 64 }
   0x2   :  { %s15_s10 = sshll.u32 %s112_s9, 4  ;;  %p65_p0 = scmp.ne.s32.totalorder %s157_s0, %s64_s13  ;;  %s16_s10 = int_to_ptr.vmem [resolvable:$true] %s15_s10 }
   0x3   :  { %p68_p1 = scmp.lt.u32.totalorder %s64_s13, %s157_s0 }
   0x5   :  { %p70_p2 = pnand %p68_p1, %p65_p0 }
   0x7   :  { %73 = shalt.err (!%p70_p2)
}
   0x8   :  { %s74_s18 = scalar_lea.vmem %s16_s10, 64  ;;  %p79_p4 = scmp.lt.s32.totalorder %s16_s10, %s16_s10 }
   0x9   :  { %p75_p3 = scmp.ne.s32.totalorder %s16_s10, %s74_s18  ;;  %p80_p5 = scmp.lt.s32.totalorder %s74_s18, %s74_s18 }
   0xb   :  { %p81_p6 = por %p80_p5, %p79_p4 }
   0xd   :  { %p82_p7 = pnand %p81_p6, %p75_p3 }
   0xf   :  { %85 = shalt.err (!%p82_p7)
}
  0x10   :  { %18 = dma.hbm_to_vmem [thread:$0]  %s157_s0, 64, %s16_s10, [#allocation3]  }
  0x11   :  { %108 = dma.done.wait [#allocation3], 64  }
  0x12   :  { %109 = vsyncadd [#allocation3], 4294967232  ;;  %v27_v0 = vlaneseq  ;;  %v113_v1 = vmov 1983009808   ;;  %v25_v7 = vld [vmem:[%s158_s1] sm:$0x3] }
  0x13   :  { %v37_v2 = vunpack.c.l.s4 %v113_v1  ;;  %v24_v12 = vld [vmem:[#allocation2] sm:$0xf]  ;;  %s114_s23 = smov [#allocation5]  }
  0x14   :  { %v28_v3 = vshrl.u32 %v27_v0, 7  ;;  %s52_s0 = sshll.u32 %s114_s23, 4  ;;  %s53_s0 = int_to_ptr.vmem [resolvable:$true] %s52_s0 }
  0x15   :  { %v38_v6 = vunpack.c.0.s8 %v37_v2  ;;  %s86_s24 = scalar_lea.vmem %s53_s0, 64  ;;  %p91_p9 = scmp.lt.s32.totalorder %s53_s0, %s53_s0 }
  0x16   :  { %v29_v4 = vsub.s32 0, %v28_v3  ;;  %v33_v5 = vsub.s32 1, %v28_v3  ;;  %p87_p8 = scmp.ne.s32.totalorder %s53_s0, %s86_s24  ;;  %p92_p10 = scmp.lt.s32.totalorder %s86_s24, %s86_s24 }
  0x17   :  { %v41_v10 = vsub.s32 %v38_v6, %v28_v3 }
  0x18   :  { %v30_v8 = vrot.slane %v25_v7, %v29_v4  ;;  %v34_v9 = vrot.slane %v25_v7, %v33_v5  ;;  %p93_p11 = por %p92_p10, %p91_p9 }
  0x1a   :  { %v35_v11 = vcombine.low %v30_v8, %v34_v9  ;;  %p94_p12 = pnand %p93_p11, %p87_p8 }
  0x1c   :  { %v42_v13 = vrot.slane %v35_v11, %v41_v10 }
  0x1e   :  { %v44_v14 = vadd.f32 %v42_v13, %v24_v12 }
  0x20   :  { %45 = vst [vmem:[#allocation5] sm:$0xf] %v44_v14 }
  0x21   :  { %97 = shalt.err (!%p94_p12)
}
  0x22   :  { %s98_s26 = scalar_lea.hbm %s159_s2, 64 }
  0x23   :  { %p99_p13 = scmp.ne.s32.totalorder %s159_s2, %s98_s26  ;;  %p102_p0 = scmp.lt.u32.totalorder %s98_s26, %s159_s2 }
  0x25   :  { %p104_p1 = pnand %p102_p0, %p99_p13 }
  0x27   :  { %107 = shalt.err (!%p104_p1)
}
  0x28   :  { %55 = dma.vmem_to_hbm [thread:$0]  %s53_s0, 64, %s159_s2, [#allocation4]  }
  0x29   :  { %110 = dma.done.wait [#allocation4], 64  }
  0x2a   :  { %111 = vsyncadd [#allocation4], 4294967232 }
  0x2b   :  { %59 = vsyncpa [#allocation3], 1 }
  0x2c   :  { %60 = vsyncpa [#allocation4], 1 }

</bundles_post_ra>
